<compile_context>
chip_gen: v6e
topology: v6e:2x2x1
jax: 0.10.0
libtpu: 0.0.40
codegen_flags: <defaults>
</compile_context>

<pallas_src>
import functools

import jax
import jax.numpy as jnp
from jax.experimental import pallas as pl
from jax.experimental.pallas import tpu as pltpu

SMOOTH = 1e-5


def _round_up(x, m):
    return ((x + m - 1) // m) * m


def _dice_sums_kernel(score_ref, target_ref, out_ref, acc_ref, *,
                      n_classes, apply_softmax, h_total, hc):
    """Accumulate per-class (intersect, y_sum, z_sum) partial sums for one image.

    score_ref  : (1, C, hc, W) VMEM block, native dtype (cast to f32 in-kernel)
    target_ref : (1, hc, W)    VMEM block, native label dtype
    out_ref    : (1, 3, C)     per-image output block (written at last h step)
    acc_ref    : (3, C, W)     lane-resident f32 VMEM accumulator scratch
    """
    h = pl.program_id(1)
    num_h = pl.num_programs(1)
    C = n_classes
    Hc, W = score_ref.shape[2], score_ref.shape[3]

    @pl.when(h == 0)
    def _init():
        acc_ref[...] = jnp.zeros_like(acc_ref)

    tgt = target_ref[0]                                     # (hc, W) native dtype

    # Tail masking: only emitted when H % hc != 0 (static), rows past H are
    # undefined in the last block and must not contribute.
    has_tail = (h_total % hc) != 0
    if has_tail:
        row_ids = jax.lax.broadcasted_iota(jnp.int32, (Hc, W), 0)
        valid = row_ids < (h_total - h * hc)

    if apply_softmax:
        # Fused channel softmax over per-class (hc, W) f32 slabs (no full
        # (C, hc, W) f32 temp); exp -> EUP slot, one reciprocal instead of C
        # divides.
        m = score_ref[0, 0].astype(jnp.float32)
        for c in range(1, C):
            m = jnp.maximum(m, score_ref[0, c].astype(jnp.float32))
        exps = []
        denom = None
        for c in range(C):
            e_c = jnp.exp(score_ref[0, c].astype(jnp.float32) - m)
            exps.append(e_c)
            denom = e_c if denom is None else denom + e_c
        inv = pl.reciprocal(denom, approx=False)

    for c in range(C):
        if apply_softmax:
            s_c = exps[c] * inv                              # (hc, W) f32
        else:
            s_c = score_ref[0, c].astype(jnp.float32)        # (hc, W) f32
        t_c = (tgt == c).astype(jnp.float32)                 # one-hot slice
        if has_tail:
            s_c = jnp.where(valid, s_c, 0.0)                 # also kills NaN/Inf garbage
            t_c = jnp.where(valid, t_c, 0.0)
        # Keep the lane axis: sublane reduce + vector add into the resident
        # accumulator (no scalar-slot RMW, no cross-lane reduce per step).
        acc_ref[0, c:c + 1, :] += jnp.sum(s_c * t_c, axis=0, keepdims=True)   # intersect
        acc_ref[1, c:c + 1, :] += jnp.sum(t_c, axis=0, keepdims=True)         # y_sum
        acc_ref[2, c:c + 1, :] += jnp.sum(s_c * s_c, axis=0, keepdims=True)   # z_sum

    @pl.when(h == num_h - 1)
    def _finalize():
        out_ref[0] = jnp.sum(acc_ref[...], axis=-1)          # (3, C), once per image


def _default_budget_bytes():
    """Score-block budget: ~4 MiB everywhere (past the >=85%-of-roofline knee),
    a bit larger when the chip reports a big VMEM (v5e/v6e: 128 MiB physical)."""
    try:
        info = pltpu.get_tpu_info()
        if getattr(info, "vmem_capacity_bytes", 0) >= (96 << 20):
            return 6 << 20
    except Exception:
        pass
    return 4 << 20


def _pick_h_chunk(H, W, C, itemsize, budget_bytes):
    """Largest hc (multiple of 32, so 8/16/32-bit label packing is satisfied)
    whose (C, hc, W) score block stays around `budget_bytes` of (lane-padded)
    VMEM.  Does NOT need to divide H: the tail is masked in-kernel."""
    per_row = max(1, C * _round_up(W, 128) * itemsize)
    max_hc = (budget_bytes // per_row // 32) * 32
    if max_hc < 32:
        max_hc = 32
    if max_hc >= H:
        return H
    return max_hc


def _vmem_limit_bytes(C, hc, W, score_itemsize, tgt_itemsize, apply_softmax):
    """Double-buffered blocks + in-kernel f32 working set + accumulator + slack."""
    w_p = _round_up(W, 128)
    hc_s = _round_up(hc, 8 * max(1, 4 // score_itemsize))
    hc_t = _round_up(hc, 8 * max(1, 4 // tgt_itemsize))
    hc_f = _round_up(hc, 8)
    score_block = C * hc_s * w_p * score_itemsize
    tgt_block = hc_t * w_p * tgt_itemsize
    n_tmp = (C + 4) if apply_softmax else 4
    tmp = n_tmp * hc_f * w_p * 4
    acc = 3 * _round_up(C, 8) * w_p * 4
    need = 2 * (score_block + tgt_block) + tmp + acc + (2 << 20)
    return int(min(max(need, 16 << 20), 64 << 20))


def dice_loss(inputs, target, n_classes, weight=None, softmax=False):
    """Pallas implementation of DiceLoss.forward.

    inputs : (N, C, H, W) float scores (any float dtype, streamed as-is)
    target : (N, H, W)    class labels (any int/float dtype, streamed as-is)
    Returns (loss_scalar, class_wise_dice); loss matches the PyTorch module.
    """
    inputs = jnp.asarray(inputs)
    target = jnp.asarray(target)
    N, C, H, W = inputs.shape
    assert C == n_classes, f"predict C={C} & n_classes={n_classes} do not match"
    assert target.shape == (N, H, W), f"target shape {target.shape} != {(N, H, W)}"

    s_isz = jnp.dtype(inputs.dtype).itemsize
    t_isz = jnp.dtype(target.dtype).itemsize
    hc = _pick_h_chunk(H, W, C, s_isz, _default_budget_bytes())
    num_h = (H + hc - 1) // hc

    kernel = functools.partial(
        _dice_sums_kernel,
        n_classes=C,
        apply_softmax=bool(softmax),
        h_total=H,
        hc=hc,
    )

    per_image = pl.pallas_call(
        kernel,
        out_shape=jax.ShapeDtypeStruct((N, 3, C), jnp.float32),
        grid_spec=pltpu.PrefetchScalarGridSpec(
            num_scalar_prefetch=0,
            grid=(N, num_h),
            in_specs=[
                # scores: all classes resident per pixel chunk, native dtype
                pl.BlockSpec((1, C, hc, W), lambda n, h: (n, 0, h, 0)),
                # labels: one pass, native dtype, shared by every class
                pl.BlockSpec((1, hc, W), lambda n, h: (n, h, 0)),
            ],
            out_specs=pl.BlockSpec((1, 3, C), lambda n, h: (n, 0, 0)),
            scratch_shapes=[pltpu.VMEM((3, C, W), jnp.float32)],
        ),
        compiler_params=pltpu.CompilerParams(
            # Batch axis is parallel (per-image output slices -> no shared
            # accumulator -> safe on v7x megacore); the H-chunk axis is the
            # reduction axis.
            dimension_semantics=("parallel", "arbitrary"),
            vmem_limit_bytes=_vmem_limit_bytes(C, hc, W, s_isz, t_isz, bool(softmax)),
        ),
    )(inputs, target)

    sums = jnp.sum(per_image, axis=0)                 # (3, C) combine images/cores
    intersect, y_sum, z_sum = sums[0], sums[1], sums[2]
    dice = 1.0 - (2.0 * intersect + SMOOTH) / (z_sum + y_sum + SMOOTH)

    if weight is None:
        weight = [1.0] * n_classes
    w = jnp.asarray(weight, jnp.float32)
    loss = jnp.sum(dice * w) / n_classes
    class_wise_dice = 1.0 - dice                       # per-class dice coefficient
    return loss, class_wise_dice


def _reference_dice_loss(inputs, target, n_classes, weight=None, softmax=False):
    """Pure-JAX reference mirroring the PyTorch module exactly."""
    if softmax:
        inputs = jax.nn.softmax(inputs, axis=1)
    one_hot = (target[:, None, :, :] ==
               jnp.arange(n_classes, dtype=target.dtype)[None, :, None, None]
               ).astype(jnp.float32)
    if weight is None:
        weight = [1.0] * n_classes
    loss = 0.0
    for i in range(n_classes):
        s = inputs[:, i].astype(jnp.float32)
        t = one_hot[:, i]
        intersect = jnp.sum(s * t)
        y_sum = jnp.sum(t * t)
        z_sum = jnp.sum(s * s)
        dice = 1.0 - (2.0 * intersect + SMOOTH) / (z_sum + y_sum + SMOOTH)
        loss = loss + dice * weight[i]
    return loss / n_classes


if __name__ == "__main__":
    N, C, H, W = 2, 4, 16, 16
    key = jax.random.PRNGKey(0)
    k1, k2 = jax.random.split(key)

    inputs = jax.random.normal(k1, (N, C, H, W), dtype=jnp.float32)
    target = jax.random.randint(k2, (N, H, W), 0, C).astype(jnp.float32)

    for use_softmax in (True, False):
        fn = jax.jit(functools.partial(dice_loss, n_classes=C, softmax=use_softmax))
        loss, class_wise_dice = fn(inputs, target)
        loss = jax.block_until_ready(loss)
        class_wise_dice = jax.block_until_ready(class_wise_dice)

        ref = _reference_dice_loss(inputs, target, C, softmax=use_softmax)
        assert jnp.allclose(loss, ref, atol=1e-5, rtol=1e-5), (use_softmax, loss, ref)

    print("KERNEL_OK")
</pallas_src>

<mosaic_0001>
module attributes {stable_mosaic.version = 11 : i64} {
  func.func @_dice_sums_kernel(%arg0: i32, %arg1: i32, %arg2: memref<1x4x16x16xf32, #tpu.memory_space<vmem>>, %arg3: memref<1x16x16xf32, #tpu.memory_space<vmem>>, %arg4: memref<1x3x4xf32, #tpu.memory_space<vmem>>, %arg5: memref<3x4x16xf32, #tpu.memory_space<vmem>>) attributes {dimension_semantics = [#tpu.dimension_semantics<parallel>, #tpu.dimension_semantics<arbitrary>], iteration_bounds = array<i64: 2, 1>, scalar_prefetch = 0 : i64, scratch_operands = 1 : i64, tpu.core_type = #tpu.core_type<tc>, window_params = [{transform_indices = @transform_0, window_bounds = array<i64: 1, 4, 16, 16>}, {transform_indices = @transform_1, window_bounds = array<i64: 1, 16, 16>}, {transform_indices = @transform_2, window_bounds = array<i64: 1, 3, 4>}]} {
    %c0_i32 = arith.constant 0 : i32
    %0 = arith.cmpi eq, %arg1, %c0_i32 : i32
    %1 = arith.extui %0 : i1 to i32
    %c0_i32_0 = arith.constant 0 : i32
    %2 = arith.cmpi ne, %1, %c0_i32_0 : i32
    scf.if %2 {
      %cst_121 = arith.constant 0.000000e+00 : f32
      %163 = vector.broadcast %cst_121 : f32 to vector<3x4x16xf32>
      %c0_122 = arith.constant 0 : index
      %c0_123 = arith.constant 0 : index
      %c0_124 = arith.constant 0 : index
      %164 = vector.load %arg5[%c0_122, %c0_123, %c0_124] : memref<3x4x16xf32, #tpu.memory_space<vmem>>, vector<3x4x16xf32>
      tpu.vector_store %arg5[%c0_122, %c0_123, %c0_124], %163 {strides = array<i32>} : memref<3x4x16xf32, #tpu.memory_space<vmem>>, vector<3x4x16xf32>,
    } else {
    }
    %c0 = arith.constant 0 : index
    %c0_1 = arith.constant 0 : index
    %c0_2 = arith.constant 0 : index
    %3 = vector.load %arg3[%c0, %c0_1, %c0_2] : memref<1x16x16xf32, #tpu.memory_space<vmem>>, vector<1x16x16xf32>
    %4 = vector.shape_cast %3 : vector<1x16x16xf32> to vector<16x16xf32>
    %c0_3 = arith.constant 0 : index
    %c0_4 = arith.constant 0 : index
    %c0_5 = arith.constant 0 : index
    %c0_6 = arith.constant 0 : index
    %5 = vector.load %arg2[%c0_3, %c0_4, %c0_5, %c0_6] : memref<1x4x16x16xf32, #tpu.memory_space<vmem>>, vector<1x1x16x16xf32>
    %6 = vector.shape_cast %5 : vector<1x1x16x16xf32> to vector<16x16xf32>
    %c0_7 = arith.constant 0 : index
    %c1 = arith.constant 1 : index
    %c0_8 = arith.constant 0 : index
    %c0_9 = arith.constant 0 : index
    %7 = vector.load %arg2[%c0_7, %c1, %c0_8, %c0_9] : memref<1x4x16x16xf32, #tpu.memory_space<vmem>>, vector<1x1x16x16xf32>
    %8 = vector.shape_cast %7 : vector<1x1x16x16xf32> to vector<16x16xf32>
    %9 = arith.maximumf %6, %8 : vector<16x16xf32>
    %c0_10 = arith.constant 0 : index
    %c2 = arith.constant 2 : index
    %c0_11 = arith.constant 0 : index
    %c0_12 = arith.constant 0 : index
    %10 = vector.load %arg2[%c0_10, %c2, %c0_11, %c0_12] : memref<1x4x16x16xf32, #tpu.memory_space<vmem>>, vector<1x1x16x16xf32>
    %11 = vector.shape_cast %10 : vector<1x1x16x16xf32> to vector<16x16xf32>
    %12 = arith.maximumf %9, %11 : vector<16x16xf32>
    %c0_13 = arith.constant 0 : index
    %c3 = arith.constant 3 : index
    %c0_14 = arith.constant 0 : index
    %c0_15 = arith.constant 0 : index
    %13 = vector.load %arg2[%c0_13, %c3, %c0_14, %c0_15] : memref<1x4x16x16xf32, #tpu.memory_space<vmem>>, vector<1x1x16x16xf32>
    %14 = vector.shape_cast %13 : vector<1x1x16x16xf32> to vector<16x16xf32>
    %15 = arith.maximumf %12, %14 : vector<16x16xf32>
    %c0_16 = arith.constant 0 : index
    %c0_17 = arith.constant 0 : index
    %c0_18 = arith.constant 0 : index
    %c0_19 = arith.constant 0 : index
    %16 = vector.load %arg2[%c0_16, %c0_17, %c0_18, %c0_19] : memref<1x4x16x16xf32, #tpu.memory_space<vmem>>, vector<1x1x16x16xf32>
    %17 = vector.shape_cast %16 : vector<1x1x16x16xf32> to vector<16x16xf32>
    %18 = arith.subf %17, %15 : vector<16x16xf32>
    %19 = math.exp %18 : vector<16x16xf32>
    %c0_20 = arith.constant 0 : index
    %c1_21 = arith.constant 1 : index
    %c0_22 = arith.constant 0 : index
    %c0_23 = arith.constant 0 : index
    %20 = vector.load %arg2[%c0_20, %c1_21, %c0_22, %c0_23] : memref<1x4x16x16xf32, #tpu.memory_space<vmem>>, vector<1x1x16x16xf32>
    %21 = vector.shape_cast %20 : vector<1x1x16x16xf32> to vector<16x16xf32>
    %22 = arith.subf %21, %15 : vector<16x16xf32>
    %23 = math.exp %22 : vector<16x16xf32>
    %24 = arith.addf %19, %23 : vector<16x16xf32>
    %c0_24 = arith.constant 0 : index
    %c2_25 = arith.constant 2 : index
    %c0_26 = arith.constant 0 : index
    %c0_27 = arith.constant 0 : index
    %25 = vector.load %arg2[%c0_24, %c2_25, %c0_26, %c0_27] : memref<1x4x16x16xf32, #tpu.memory_space<vmem>>, vector<1x1x16x16xf32>
    %26 = vector.shape_cast %25 : vector<1x1x16x16xf32> to vector<16x16xf32>
    %27 = arith.subf %26, %15 : vector<16x16xf32>
    %28 = math.exp %27 : vector<16x16xf32>
    %29 = arith.addf %24, %28 : vector<16x16xf32>
    %c0_28 = arith.constant 0 : index
    %c3_29 = arith.constant 3 : index
    %c0_30 = arith.constant 0 : index
    %c0_31 = arith.constant 0 : index
    %30 = vector.load %arg2[%c0_28, %c3_29, %c0_30, %c0_31] : memref<1x4x16x16xf32, #tpu.memory_space<vmem>>, vector<1x1x16x16xf32>
    %31 = vector.shape_cast %30 : vector<1x1x16x16xf32> to vector<16x16xf32>
    %32 = arith.subf %31, %15 : vector<16x16xf32>
    %33 = math.exp %32 : vector<16x16xf32>
    %34 = arith.addf %29, %33 : vector<16x16xf32>
    %35 = tpu.reciprocal %34 : vector<16x16xf32> -> vector<16x16xf32>
    %36 = arith.mulf %19, %35 : vector<16x16xf32>
    %cst = arith.constant 0.000000e+00 : f32
    %37 = vector.broadcast %cst : f32 to vector<16x16xf32>
    %38 = arith.cmpf oeq, %4, %37 : vector<16x16xf32>
    %39 = arith.extui %38 : vector<16x16xi1> to vector<16x16xi32>
    %40 = arith.sitofp %39 : vector<16x16xi32> to vector<16x16xf32>
    %c0_32 = arith.constant 0 : index
    %c0_33 = arith.constant 0 : index
    %c0_34 = arith.constant 0 : index
    %41 = vector.load %arg5[%c0_32, %c0_33, %c0_34] : memref<3x4x16xf32, #tpu.memory_space<vmem>>, vector<1x1x16xf32>
    %42 = vector.shape_cast %41 : vector<1x1x16xf32> to vector<1x16xf32>
    %43 = arith.mulf %36, %40 : vector<16x16xf32>
    %cst_35 = arith.constant dense<0.000000e+00> : vector<16xf32>
    %44 = vector.multi_reduction <add>, %43, %cst_35 [0] : vector<16x16xf32> to vector<16xf32>
    %45 = vector.shape_cast %44 : vector<16xf32> to vector<1x16xf32>
    %46 = arith.addf %42, %45 : vector<1x16xf32>
    %c0_36 = arith.constant 0 : index
    %c0_37 = arith.constant 0 : index
    %c0_38 = arith.constant 0 : index
    %47 = vector.load %arg5[%c0_36, %c0_37, %c0_38] : memref<3x4x16xf32, #tpu.memory_space<vmem>>, vector<1x1x16xf32>
    %48 = vector.shape_cast %47 : vector<1x1x16xf32> to vector<1x16xf32>
    %49 = vector.shape_cast %46 : vector<1x16xf32> to vector<1x1x16xf32>
    tpu.vector_store %arg5[%c0_36, %c0_37, %c0_38], %49 {strides = array<i32>} : memref<3x4x16xf32, #tpu.memory_space<vmem>>, vector<1x1x16xf32>,
    %c1_39 = arith.constant 1 : index
    %c0_40 = arith.constant 0 : index
    %c0_41 = arith.constant 0 : index
    %50 = vector.load %arg5[%c1_39, %c0_40, %c0_41] : memref<3x4x16xf32, #tpu.memory_space<vmem>>, vector<1x1x16xf32>
    %51 = vector.shape_cast %50 : vector<1x1x16xf32> to vector<1x16xf32>
    %cst_42 = arith.constant dense<0.000000e+00> : vector<16xf32>
    %52 = vector.multi_reduction <add>, %40, %cst_42 [0] : vector<16x16xf32> to vector<16xf32>
    %53 = vector.shape_cast %52 : vector<16xf32> to vector<1x16xf32>
    %54 = arith.addf %51, %53 : vector<1x16xf32>
    %c1_43 = arith.constant 1 : index
    %c0_44 = arith.constant 0 : index
    %c0_45 = arith.constant 0 : index
    %55 = vector.load %arg5[%c1_43, %c0_44, %c0_45] : memref<3x4x16xf32, #tpu.memory_space<vmem>>, vector<1x1x16xf32>
    %56 = vector.shape_cast %55 : vector<1x1x16xf32> to vector<1x16xf32>
    %57 = vector.shape_cast %54 : vector<1x16xf32> to vector<1x1x16xf32>
    tpu.vector_store %arg5[%c1_43, %c0_44, %c0_45], %57 {strides = array<i32>} : memref<3x4x16xf32, #tpu.memory_space<vmem>>, vector<1x1x16xf32>,
    %c2_46 = arith.constant 2 : index
    %c0_47 = arith.constant 0 : index
    %c0_48 = arith.constant 0 : index
    %58 = vector.load %arg5[%c2_46, %c0_47, %c0_48] : memref<3x4x16xf32, #tpu.memory_space<vmem>>, vector<1x1x16xf32>
    %59 = vector.shape_cast %58 : vector<1x1x16xf32> to vector<1x16xf32>
    %60 = arith.mulf %36, %36 : vector<16x16xf32>
    %cst_49 = arith.constant dense<0.000000e+00> : vector<16xf32>
    %61 = vector.multi_reduction <add>, %60, %cst_49 [0] : vector<16x16xf32> to vector<16xf32>
    %62 = vector.shape_cast %61 : vector<16xf32> to vector<1x16xf32>
    %63 = arith.addf %59, %62 : vector<1x16xf32>
    %c2_50 = arith.constant 2 : index
    %c0_51 = arith.constant 0 : index
    %c0_52 = arith.constant 0 : index
    %64 = vector.load %arg5[%c2_50, %c0_51, %c0_52] : memref<3x4x16xf32, #tpu.memory_space<vmem>>, vector<1x1x16xf32>
    %65 = vector.shape_cast %64 : vector<1x1x16xf32> to vector<1x16xf32>
    %66 = vector.shape_cast %63 : vector<1x16xf32> to vector<1x1x16xf32>
    tpu.vector_store %arg5[%c2_50, %c0_51, %c0_52], %66 {strides = array<i32>} : memref<3x4x16xf32, #tpu.memory_space<vmem>>, vector<1x1x16xf32>,
    %67 = arith.mulf %23, %35 : vector<16x16xf32>
    %cst_53 = arith.constant 1.000000e+00 : f32
    %68 = vector.broadcast %cst_53 : f32 to vector<16x16xf32>
    %69 = arith.cmpf oeq, %4, %68 : vector<16x16xf32>
    %70 = arith.extui %69 : vector<16x16xi1> to vector<16x16xi32>
    %71 = arith.sitofp %70 : vector<16x16xi32> to vector<16x16xf32>
    %c0_54 = arith.constant 0 : index
    %c1_55 = arith.constant 1 : index
    %c0_56 = arith.constant 0 : index
    %72 = vector.load %arg5[%c0_54, %c1_55, %c0_56] : memref<3x4x16xf32, #tpu.memory_space<vmem>>, vector<1x1x16xf32>
    %73 = vector.shape_cast %72 : vector<1x1x16xf32> to vector<1x16xf32>
    %74 = arith.mulf %67, %71 : vector<16x16xf32>
    %cst_57 = arith.constant dense<0.000000e+00> : vector<16xf32>
    %75 = vector.multi_reduction <add>, %74, %cst_57 [0] : vector<16x16xf32> to vector<16xf32>
    %76 = vector.shape_cast %75 : vector<16xf32> to vector<1x16xf32>
    %77 = arith.addf %73, %76 : vector<1x16xf32>
    %c0_58 = arith.constant 0 : index
    %c1_59 = arith.constant 1 : index
    %c0_60 = arith.constant 0 : index
    %78 = vector.load %arg5[%c0_58, %c1_59, %c0_60] : memref<3x4x16xf32, #tpu.memory_space<vmem>>, vector<1x1x16xf32>
    %79 = vector.shape_cast %78 : vector<1x1x16xf32> to vector<1x16xf32>
    %80 = vector.shape_cast %77 : vector<1x16xf32> to vector<1x1x16xf32>
    tpu.vector_store %arg5[%c0_58, %c1_59, %c0_60], %80 {strides = array<i32>} : memref<3x4x16xf32, #tpu.memory_space<vmem>>, vector<1x1x16xf32>,
    %c1_61 = arith.constant 1 : index
    %c1_62 = arith.constant 1 : index
    %c0_63 = arith.constant 0 : index
    %81 = vector.load %arg5[%c1_61, %c1_62, %c0_63] : memref<3x4x16xf32, #tpu.memory_space<vmem>>, vector<1x1x16xf32>
    %82 = vector.shape_cast %81 : vector<1x1x16xf32> to vector<1x16xf32>
    %cst_64 = arith.constant dense<0.000000e+00> : vector<16xf32>
    %83 = vector.multi_reduction <add>, %71, %cst_64 [0] : vector<16x16xf32> to vector<16xf32>
    %84 = vector.shape_cast %83 : vector<16xf32> to vector<1x16xf32>
    %85 = arith.addf %82, %84 : vector<1x16xf32>
    %c1_65 = arith.constant 1 : index
    %c1_66 = arith.constant 1 : index
    %c0_67 = arith.constant 0 : index
    %86 = vector.load %arg5[%c1_65, %c1_66, %c0_67] : memref<3x4x16xf32, #tpu.memory_space<vmem>>, vector<1x1x16xf32>
    %87 = vector.shape_cast %86 : vector<1x1x16xf32> to vector<1x16xf32>
    %88 = vector.shape_cast %85 : vector<1x16xf32> to vector<1x1x16xf32>
    tpu.vector_store %arg5[%c1_65, %c1_66, %c0_67], %88 {strides = array<i32>} : memref<3x4x16xf32, #tpu.memory_space<vmem>>, vector<1x1x16xf32>,
    %c2_68 = arith.constant 2 : index
    %c1_69 = arith.constant 1 : index
    %c0_70 = arith.constant 0 : index
    %89 = vector.load %arg5[%c2_68, %c1_69, %c0_70] : memref<3x4x16xf32, #tpu.memory_space<vmem>>, vector<1x1x16xf32>
    %90 = vector.shape_cast %89 : vector<1x1x16xf32> to vector<1x16xf32>
    %91 = arith.mulf %67, %67 : vector<16x16xf32>
    %cst_71 = arith.constant dense<0.000000e+00> : vector<16xf32>
    %92 = vector.multi_reduction <add>, %91, %cst_71 [0] : vector<16x16xf32> to vector<16xf32>
    %93 = vector.shape_cast %92 : vector<16xf32> to vector<1x16xf32>
    %94 = arith.addf %90, %93 : vector<1x16xf32>
    %c2_72 = arith.constant 2 : index
    %c1_73 = arith.constant 1 : index
    %c0_74 = arith.constant 0 : index
    %95 = vector.load %arg5[%c2_72, %c1_73, %c0_74] : memref<3x4x16xf32, #tpu.memory_space<vmem>>, vector<1x1x16xf32>
    %96 = vector.shape_cast %95 : vector<1x1x16xf32> to vector<1x16xf32>
    %97 = vector.shape_cast %94 : vector<1x16xf32> to vector<1x1x16xf32>
    tpu.vector_store %arg5[%c2_72, %c1_73, %c0_74], %97 {strides = array<i32>} : memref<3x4x16xf32, #tpu.memory_space<vmem>>, vector<1x1x16xf32>,
    %98 = arith.mulf %28, %35 : vector<16x16xf32>
    %cst_75 = arith.constant 2.000000e+00 : f32
    %99 = vector.broadcast %cst_75 : f32 to vector<16x16xf32>
    %100 = arith.cmpf oeq, %4, %99 : vector<16x16xf32>
    %101 = arith.extui %100 : vector<16x16xi1> to vector<16x16xi32>
    %102 = arith.sitofp %101 : vector<16x16xi32> to vector<16x16xf32>
    %c0_76 = arith.constant 0 : index
    %c2_77 = arith.constant 2 : index
    %c0_78 = arith.constant 0 : index
    %103 = vector.load %arg5[%c0_76, %c2_77, %c0_78] : memref<3x4x16xf32, #tpu.memory_space<vmem>>, vector<1x1x16xf32>
    %104 = vector.shape_cast %103 : vector<1x1x16xf32> to vector<1x16xf32>
    %105 = arith.mulf %98, %102 : vector<16x16xf32>
    %cst_79 = arith.constant dense<0.000000e+00> : vector<16xf32>
    %106 = vector.multi_reduction <add>, %105, %cst_79 [0] : vector<16x16xf32> to vector<16xf32>
    %107 = vector.shape_cast %106 : vector<16xf32> to vector<1x16xf32>
    %108 = arith.addf %104, %107 : vector<1x16xf32>
    %c0_80 = arith.constant 0 : index
    %c2_81 = arith.constant 2 : index
    %c0_82 = arith.constant 0 : index
    %109 = vector.load %arg5[%c0_80, %c2_81, %c0_82] : memref<3x4x16xf32, #tpu.memory_space<vmem>>, vector<1x1x16xf32>
    %110 = vector.shape_cast %109 : vector<1x1x16xf32> to vector<1x16xf32>
    %111 = vector.shape_cast %108 : vector<1x16xf32> to vector<1x1x16xf32>
    tpu.vector_store %arg5[%c0_80, %c2_81, %c0_82], %111 {strides = array<i32>} : memref<3x4x16xf32, #tpu.memory_space<vmem>>, vector<1x1x16xf32>,
    %c1_83 = arith.constant 1 : index
    %c2_84 = arith.constant 2 : index
    %c0_85 = arith.constant 0 : index
    %112 = vector.load %arg5[%c1_83, %c2_84, %c0_85] : memref<3x4x16xf32, #tpu.memory_space<vmem>>, vector<1x1x16xf32>
    %113 = vector.shape_cast %112 : vector<1x1x16xf32> to vector<1x16xf32>
    %cst_86 = arith.constant dense<0.000000e+00> : vector<16xf32>
    %114 = vector.multi_reduction <add>, %102, %cst_86 [0] : vector<16x16xf32> to vector<16xf32>
    %115 = vector.shape_cast %114 : vector<16xf32> to vector<1x16xf32>
    %116 = arith.addf %113, %115 : vector<1x16xf32>
    %c1_87 = arith.constant 1 : index
    %c2_88 = arith.constant 2 : index
    %c0_89 = arith.constant 0 : index
    %117 = vector.load %arg5[%c1_87, %c2_88, %c0_89] : memref<3x4x16xf32, #tpu.memory_space<vmem>>, vector<1x1x16xf32>
    %118 = vector.shape_cast %117 : vector<1x1x16xf32> to vector<1x16xf32>
    %119 = vector.shape_cast %116 : vector<1x16xf32> to vector<1x1x16xf32>
    tpu.vector_store %arg5[%c1_87, %c2_88, %c0_89], %119 {strides = array<i32>} : memref<3x4x16xf32, #tpu.memory_space<vmem>>, vector<1x1x16xf32>,
    %c2_90 = arith.constant 2 : index
    %c2_91 = arith.constant 2 : index
    %c0_92 = arith.constant 0 : index
    %120 = vector.load %arg5[%c2_90, %c2_91, %c0_92] : memref<3x4x16xf32, #tpu.memory_space<vmem>>, vector<1x1x16xf32>
    %121 = vector.shape_cast %120 : vector<1x1x16xf32> to vector<1x16xf32>
    %122 = arith.mulf %98, %98 : vector<16x16xf32>
    %cst_93 = arith.constant dense<0.000000e+00> : vector<16xf32>
    %123 = vector.multi_reduction <add>, %122, %cst_93 [0] : vector<16x16xf32> to vector<16xf32>
    %124 = vector.shape_cast %123 : vector<16xf32> to vector<1x16xf32>
    %125 = arith.addf %121, %124 : vector<1x16xf32>
    %c2_94 = arith.constant 2 : index
    %c2_95 = arith.constant 2 : index
    %c0_96 = arith.constant 0 : index
    %126 = vector.load %arg5[%c2_94, %c2_95, %c0_96] : memref<3x4x16xf32, #tpu.memory_space<vmem>>, vector<1x1x16xf32>
    %127 = vector.shape_cast %126 : vector<1x1x16xf32> to vector<1x16xf32>
    %128 = vector.shape_cast %125 : vector<1x16xf32> to vector<1x1x16xf32>
    tpu.vector_store %arg5[%c2_94, %c2_95, %c0_96], %128 {strides = array<i32>} : memref<3x4x16xf32, #tpu.memory_space<vmem>>, vector<1x1x16xf32>,
    %129 = arith.mulf %33, %35 : vector<16x16xf32>
    %cst_97 = arith.constant 3.000000e+00 : f32
    %130 = vector.broadcast %cst_97 : f32 to vector<16x16xf32>
    %131 = arith.cmpf oeq, %4, %130 : vector<16x16xf32>
    %132 = arith.extui %131 : vector<16x16xi1> to vector<16x16xi32>
    %133 = arith.sitofp %132 : vector<16x16xi32> to vector<16x16xf32>
    %c0_98 = arith.constant 0 : index
    %c3_99 = arith.constant 3 : index
    %c0_100 = arith.constant 0 : index
    %134 = vector.load %arg5[%c0_98, %c3_99, %c0_100] : memref<3x4x16xf32, #tpu.memory_space<vmem>>, vector<1x1x16xf32>
    %135 = vector.shape_cast %134 : vector<1x1x16xf32> to vector<1x16xf32>
    %136 = arith.mulf %129, %133 : vector<16x16xf32>
    %cst_101 = arith.constant dense<0.000000e+00> : vector<16xf32>
    %137 = vector.multi_reduction <add>, %136, %cst_101 [0] : vector<16x16xf32> to vector<16xf32>
    %138 = vector.shape_cast %137 : vector<16xf32> to vector<1x16xf32>
    %139 = arith.addf %135, %138 : vector<1x16xf32>
    %c0_102 = arith.constant 0 : index
    %c3_103 = arith.constant 3 : index
    %c0_104 = arith.constant 0 : index
    %140 = vector.load %arg5[%c0_102, %c3_103, %c0_104] : memref<3x4x16xf32, #tpu.memory_space<vmem>>, vector<1x1x16xf32>
    %141 = vector.shape_cast %140 : vector<1x1x16xf32> to vector<1x16xf32>
    %142 = vector.shape_cast %139 : vector<1x16xf32> to vector<1x1x16xf32>
    tpu.vector_store %arg5[%c0_102, %c3_103, %c0_104], %142 {strides = array<i32>} : memref<3x4x16xf32, #tpu.memory_space<vmem>>, vector<1x1x16xf32>,
    %c1_105 = arith.constant 1 : index
    %c3_106 = arith.constant 3 : index
    %c0_107 = arith.constant 0 : index
    %143 = vector.load %arg5[%c1_105, %c3_106, %c0_107] : memref<3x4x16xf32, #tpu.memory_space<vmem>>, vector<1x1x16xf32>
    %144 = vector.shape_cast %143 : vector<1x1x16xf32> to vector<1x16xf32>
    %cst_108 = arith.constant dense<0.000000e+00> : vector<16xf32>
    %145 = vector.multi_reduction <add>, %133, %cst_108 [0] : vector<16x16xf32> to vector<16xf32>
    %146 = vector.shape_cast %145 : vector<16xf32> to vector<1x16xf32>
    %147 = arith.addf %144, %146 : vector<1x16xf32>
    %c1_109 = arith.constant 1 : index
    %c3_110 = arith.constant 3 : index
    %c0_111 = arith.constant 0 : index
    %148 = vector.load %arg5[%c1_109, %c3_110, %c0_111] : memref<3x4x16xf32, #tpu.memory_space<vmem>>, vector<1x1x16xf32>
    %149 = vector.shape_cast %148 : vector<1x1x16xf32> to vector<1x16xf32>
    %150 = vector.shape_cast %147 : vector<1x16xf32> to vector<1x1x16xf32>
    tpu.vector_store %arg5[%c1_109, %c3_110, %c0_111], %150 {strides = array<i32>} : memref<3x4x16xf32, #tpu.memory_space<vmem>>, vector<1x1x16xf32>,
    %c2_112 = arith.constant 2 : index
    %c3_113 = arith.constant 3 : index
    %c0_114 = arith.constant 0 : index
    %151 = vector.load %arg5[%c2_112, %c3_113, %c0_114] : memref<3x4x16xf32, #tpu.memory_space<vmem>>, vector<1x1x16xf32>
    %152 = vector.shape_cast %151 : vector<1x1x16xf32> to vector<1x16xf32>
    %153 = arith.mulf %129, %129 : vector<16x16xf32>
    %cst_115 = arith.constant dense<0.000000e+00> : vector<16xf32>
    %154 = vector.multi_reduction <add>, %153, %cst_115 [0] : vector<16x16xf32> to vector<16xf32>
    %155 = vector.shape_cast %154 : vector<16xf32> to vector<1x16xf32>
    %156 = arith.addf %152, %155 : vector<1x16xf32>
    %c2_116 = arith.constant 2 : index
    %c3_117 = arith.constant 3 : index
    %c0_118 = arith.constant 0 : index
    %157 = vector.load %arg5[%c2_116, %c3_117, %c0_118] : memref<3x4x16xf32, #tpu.memory_space<vmem>>, vector<1x1x16xf32>
    %158 = vector.shape_cast %157 : vector<1x1x16xf32> to vector<1x16xf32>
    %159 = vector.shape_cast %156 : vector<1x16xf32> to vector<1x1x16xf32>
    tpu.vector_store %arg5[%c2_116, %c3_117, %c0_118], %159 {strides = array<i32>} : memref<3x4x16xf32, #tpu.memory_space<vmem>>, vector<1x1x16xf32>,
    %c0_i32_119 = arith.constant 0 : i32
    %160 = arith.cmpi eq, %arg1, %c0_i32_119 : i32
    %161 = arith.extui %160 : i1 to i32
    %c0_i32_120 = arith.constant 0 : i32
    %162 = arith.cmpi ne, %161, %c0_i32_120 : i32
    scf.if %162 {
      %c0_121 = arith.constant 0 : index
      %c0_122 = arith.constant 0 : index
      %c0_123 = arith.constant 0 : index
      %163 = vector.load %arg5[%c0_121, %c0_122, %c0_123] : memref<3x4x16xf32, #tpu.memory_space<vmem>>, vector<3x4x16xf32>
      %cst_124 = arith.constant dense<0.000000e+00> : vector<3x4xf32>
      %164 = vector.multi_reduction <add>, %163, %cst_124 [2] : vector<3x4x16xf32> to vector<3x4xf32>
      %c0_125 = arith.constant 0 : index
      %c0_126 = arith.constant 0 : index
      %c0_127 = arith.constant 0 : index
      %165 = vector.load %arg4[%c0_125, %c0_126, %c0_127] : memref<1x3x4xf32, #tpu.memory_space<vmem>>, vector<1x3x4xf32>
      %166 = vector.shape_cast %165 : vector<1x3x4xf32> to vector<3x4xf32>
      %167 = vector.shape_cast %164 : vector<3x4xf32> to vector<1x3x4xf32>
      tpu.vector_store %arg4[%c0_125, %c0_126, %c0_127], %167 {strides = array<i32>} : memref<1x3x4xf32, #tpu.memory_space<vmem>>, vector<1x3x4xf32>,
    } else {
    }
    return
  }
  func.func @transform_0(%arg0: i32, %arg1: i32) -> (i32, i32, i32, i32) {
    %c0_i32 = arith.constant 0 : i32
    %c0_i32_0 = arith.constant 0 : i32
    %c0_i32_1 = arith.constant 0 : i32
    return %arg0, %c0_i32, %arg1, %c0_i32_0 : i32, i32, i32, i32
  }
  func.func @transform_1(%arg0: i32, %arg1: i32) -> (i32, i32, i32) {
    %c0_i32 = arith.constant 0 : i32
    %c0_i32_0 = arith.constant 0 : i32
    return %arg0, %arg1, %c0_i32 : i32, i32, i32
  }
  func.func @transform_2(%arg0: i32, %arg1: i32) -> (i32, i32, i32) {
    %c0_i32 = arith.constant 0 : i32
    %c0_i32_0 = arith.constant 0 : i32
    %c0_i32_1 = arith.constant 0 : i32
    return %arg0, %c0_i32, %c0_i32_0 : i32, i32, i32
  }
}

</mosaic_0001>

<bundles_post_ra>
// kernel: dice_loss.1
= control target key start
LH: loop header
LB: loop body
LE: loop exit
PB: predicated region body
PF: predicated region fallthrough
CT: control target
= control target key end

     0   :  { %7 = vsyncpa [#allocation4], 0  ;;  %s1077_s0 = inlined_call_operand.hbm [shape: f32[2,4,16,16], index: 0, kind: input, shape index: {}]   ;;  %s1078_s1 = inlined_call_operand.hbm [shape: f32[2,16,16], index: 1, kind: input, shape index: {}]   ;;  %s1079_s2 = inlined_call_operand.vmem [shape: f32[2,3,4], index: 2, kind: output, shape index: {}]  }
   0x1   :  { %9 = vsyncpa [#allocation4 + $0x1], 0 }
   0x2   :  { %10 = vsyncpa [#allocation6], 0 }
   0x3   :  { %12 = vsyncpa [#allocation6 + $0x1], 0  ;;  %s868_s9 = smov 0   ;;  %s870_s10 = smov 0  }
   0x4   :  { %s872_s11 = smov 0   ;;  %s874_s12 = smov 0  }
   0x5   :  { %s876_s13 = smov 0   ;;  %s878_s14 = smov 0  }
   0x6 LB: > { %s621_s15 = sadd.s32 4294967295, %s846_s14   ;;  %s30_s16 = sadd.s32 1, %s842_s13  ;;  %s846_s14 = sphi %s878_s14, %s18_s14   ;;  %s842_s13 = sphi %s876_s13, %s1088_s13   ;;  %s838_s12 = sphi %s874_s12, %s1087_s12   ;;  %s834_s11 = sphi %s872_s11, %s1086_s11   ;;  %s830_s10 = sphi %s870_s10, %s1085_s10   ;;  %s826_s9 = sphi %s868_s9, %s1084_s9  }
   0x7   : > { %p32_p0 = scmp.ge.s32.totalorder %s30_s16, 2  ;;  %s39_s17 = sadd.s32 1, %s834_s11 }
   0x8   : > { %p46_p1 = scmp.ne.s32.totalorder %s834_s11, %s830_s10  ;;  %p47_p2 = scmp.eq.s32.totalorder %s846_s14, 0 }
   0x9   : > { %s1090_s16 = smov (%p32_p0, %s30_s16), 0  ;;  %p52_p4 = scmp.ne.s32.totalorder %s830_s10, %s826_s9 }
   0xa   : > { %p904_p3 = por %p47_p2, %p46_p1  ;;  %s34_s19 = ssub.s32 %s842_s13, %s1090_s16 }
   0xb   : > { %p53_p5 = scmp.eq.s32.totalorder %s621_s15, 0  ;;  %p37_p6 = scmp.eq.s32.totalorder %s34_s19, 0 }
   0xc   : > { %p664_p8 = scmp.lt.s32.totalorder %s846_s14, 2  ;;  %s920_s22 = sand.u32 1, %s834_s11  }
   0xd   : > { %p911_p7 = por %p53_p5, %p52_p4  ;;  %s651_s23 = sshll.u32 %s842_s13, 10 }
   0xe   : > { %s917_s21 = scalar_select %p37_p6, %s834_s11, %s39_s17  }
   0xf   : > { %s625_s24 = sshll.u32 %s920_s22, 6  ;;  %s142_s27 = scalar_lea.hbm %s1077_s0, %s651_s23 }
  0x10   : > { %s134_s28 = scalar_lea.vmem [#allocation3], %s625_s24  ;;  %p929_p9 = pnand %p664_p8, %p904_p3 }
  0x11   : > { %s143_s29 = sshll.u32 %s134_s28, 4  ;;  %s131_s3 = scalar_lea.sflag [#allocation4], %s920_s22  ;;  %s144_s29 = int_to_ptr.vmem [resolvable:$true] %s143_s29 }
  0x12   : > { %p738_p10 = pneg %p929_p9  ;;  %s749_s4 = scalar_lea.vmem %s144_s29, 1024 }
  0x13   : > { %p750_p11 = scmp.ne.s32.totalorder %s144_s29, %s749_s4  ;;  %s848_s5 = smov [#allocation3]  }
  0x14   : > { %s754_s6 = sshll.u32 %s848_s5, 4  ;;  %s755_s6 = int_to_ptr.vmem [resolvable:$false] %s754_s6 }
  0x15   : > { %p752_p12 = pnand %p750_p11, %p738_p10  ;;  %s756_s7 = scalar_lea.vmem %s755_s6, 2048 }
  0x16   : > { %p757_p0 = scmp.lt.s32.totalorder %s144_s29, %s755_s6  ;;  %p758_p1 = scmp.lt.s32.totalorder %s756_s7, %s749_s4 }
  0x17   : > { %p753_p13 = pneg %p752_p12 }
  0x18   : > { %p759_p2 = por %p758_p1, %p757_p0 }
  0x1a   : > { %p760_p3 = pnand %p759_p2, %p753_p13 }
  0x1c   : > { %763 = shalt.err (!%p760_p3)
}
  0x1d   : > { %s849_s8 = smov 128   ;;  %s850_s9 = smov 8  }
  0x1e   : > { %660 = dma.hbm_to_vmem [thread:$0]  (!%p929_p9), %s142_s27, 1024, %s144_s29, %s131_s3, %s849_s8, %s849_s8, %s850_s9  }
  0x1f   : > { %p631_p4 = scmp.ge.s32.totalorder %s846_s14, 1  ;;  %p174_p5 = scmp.lt.s32.totalorder %s846_s14, 3 }
  0x20   : > { %s628_s15 = sshll.u32 %s920_s22, 4  ;;  %s652_s18 = sshll.u32 %s842_s13, 8 }
  0x21   : > { %p947_p6 = pnand %p631_p4, %p174_p5  ;;  %s157_s19 = scalar_lea.vmem [#allocation5], %s628_s15 }
  0x22   : > { %s166_s23 = sshll.u32 %s157_s19, 4  ;;  %s165_s26 = scalar_lea.hbm %s1078_s1, %s652_s18  ;;  %s167_s23 = int_to_ptr.vmem [resolvable:$true] %s166_s23 }
  0x23   : > { %s154_s28 = scalar_lea.sflag [#allocation6], %s920_s22  ;;  %s777_s4 = scalar_lea.vmem %s167_s23, 256 }
  0x24   : > { %p778_p8 = scmp.ne.s32.totalorder %s167_s23, %s777_s4  ;;  %s851_s27 = smov [#allocation5]  }
  0x25   : > { %s782_s29 = sshll.u32 %s851_s27, 4  ;;  %s783_s29 = int_to_ptr.vmem [resolvable:$false] %s782_s29 }
  0x26   : > { %p780_p11 = pnand %p778_p8, %p738_p10  ;;  %s784_s3 = scalar_lea.vmem %s783_s29, 512 }
  0x27   : > { %p785_p13 = scmp.lt.s32.totalorder %s167_s23, %s783_s29  ;;  %p786_p0 = scmp.lt.s32.totalorder %s784_s3, %s777_s4 }
  0x28   : > { %p781_p12 = pneg %p780_p11 }
  0x29   : > { %p787_p1 = por %p786_p0, %p785_p13 }
  0x2b   : > { %p788_p2 = pnand %p787_p1, %p781_p12 }
  0x2d   : > { %791 = shalt.err (!%p788_p2)
}
  0x2e   : > { %663 = dma.hbm_to_vmem [thread:$0]  (!%p929_p9), %s165_s26, 256, %s167_s23, %s154_s28, %s849_s8, %s849_s8, %s850_s9  }
  0x2f   : > { %178 = sbr.rel (%p947_p6) target bundleno = 294 (0x126), region = 28  ;;  %s180_s22 = sand.u32 (!%p947_p6), 1, %s830_s10  }
  0x30   : > { %s632_s5 = sshll.u32 (!%p947_p6), %s180_s22, 6  ;;  %s181_s6 = scalar_lea.sflag (!%p947_p6), [#allocation4], %s180_s22 }
  0x31   : > { %s184_s7 = scalar_lea.vmem (!%p947_p6), [#allocation3], %s632_s5 }
  0x34   : > { %817 = dma.done.wait (%p911_p7), %s181_s6, 1024  }
  0x35   : > { %819 = vsyncadd (%p911_p7), %s181_s6, 4294966272  ;;  %s633_s30 = sshll.u32 %s180_s22, 4  ;;  %s190_s15 = scalar_lea.sflag [#allocation6], %s180_s22 }
  0x36   : > { %s193_s18 = scalar_lea.vmem [#allocation5], %s633_s30 }
  0x37   : > { %821 = dma.done.wait (%p911_p7), %s190_s15, 256  }
  0x38   : > { %823 = vsyncadd (%p911_p7), %s190_s15, 4294967040  ;;  %vm228_vm0 = vcmask 125952   ;;  %v852_v0 = vmov 0.0   ;;  %v232_v1 = vld [vmem:[%s193_s18] sm:$0xff]  ;;  %v233_v2 = vld [vmem:[%s193_s18 + $0x8] sm:$0xff]  ;;  %vm294_vm4 = vcmask 130048  }
  0x39   : > { %229 = vst.msk [vmem:[#allocation2] sm:$0xf] %vm228_vm0, %v852_v0  ;;  %230 = vst.msk [vmem:[#allocation2 + $0x4] sm:$0xf] %vm228_vm0, %v852_v0  ;;  %v234_v3 = vld [vmem:[%s184_s7] sm:$0xff]  ;;  %v235_v4 = vld [vmem:[%s184_s7 + $0x8] sm:$0xff] }
  0x3a   : > { %231 = vst.msk [vmem:[#allocation2 + $0x8] sm:$0xf] %vm228_vm0, %v852_v0  ;;  %v635_v5 = vld [vmem:[%s184_s7 + $0x10] sm:$0xff]  ;;  %v636_v6 = vld [vmem:[%s184_s7 + $0x18] sm:$0xff]  ;;  %vm285_vm1 = vcmp.eq.f32.partialorder %v232_v1, 0.0  ;;  %vm286_vm2 = vcmp.eq.f32.partialorder %v233_v2, 0.0 }
  0x3b   : > { %vm337_vm3 = vcmp.eq.f32.partialorder %v232_v1, 1.0  ;;  %v239_v7 = vmax.f32 %v234_v3, %v635_v5  ;;  %v240_v8 = vmax.f32 %v235_v4, %v636_v6  ;;  %v637_v9 = vld [vmem:[%s184_s7 + $0x20] sm:$0xff]  ;;  %v638_v10 = vld [vmem:[%s184_s7 + $0x28] sm:$0xff]  ;;  %v639_v11 = vld [vmem:[%s184_s7 + $0x30] sm:$0xff]  ;;  %v978_v13 = vsel %vm285_vm1, 1.0, %v852_v0  ;;  %p220_p7 = scmp.lt.s32.totalorder %s838_s12, 1 }
  0x3c   : > { %v640_v12 = vld [vmem:[%s184_s7 + $0x38] sm:$0xff]  ;;  %v980_v14 = vsel %vm286_vm2, 1.0, %v852_v0  ;;  %vm338_vm5 = vcmp.eq.f32.partialorder %v233_v2, 1.0  ;;  %vm385_vm6 = vcmp.eq.f32.partialorder %v232_v1, 2.0  ;;  %v982_v17 = vsel %vm337_vm3, 1.0, %v852_v0 }
  0x3d   : > { %v244_v15 = vmax.f32 %v239_v7, %v637_v9  ;;  %v245_v16 = vmax.f32 %v240_v8, %v638_v10  ;;  %vm386_vm7 = vcmp.eq.f32.partialorder %v233_v2, 2.0  ;;  %v984_v18 = vsel %vm338_vm5, 1.0, %v852_v0  ;;  %s1092_s12 = smov (!%p220_p7, %s838_s12), 1 }
  0x3e   : > { %v986_v19 = vsel %vm385_vm6, 1.0, %v852_v0  ;;  %v988_v20 = vsel %vm386_vm7, 1.0, %v852_v0  ;;  %vm433_vm8 = vcmp.eq.f32.partialorder %v232_v1, 3.0  ;;  %vm434_vm9 = vcmp.eq.f32.partialorder %v233_v2, 3.0  ;;  %s634_s20 = sshll.u32 %s1092_s12, 2 }
  0x3f   : > { %v249_v21 = vmax.f32 %v244_v15, %v639_v11  ;;  %v250_v22 = vmax.f32 %v245_v16, %v640_v12  ;;  %v990_v23 = vsel %vm433_vm8, 1.0, %v852_v0  ;;  %v309_v24 = vsel %vm294_vm4, %v978_v13, 0.0  ;;  %s223_s17 = scalar_lea.vmem %s1079_s2, %s634_s20 }
  0x40   : > { %v310_v25 = vsel %vm294_vm4, %v980_v14, 0.0  ;;  %v358_v26 = vsel %vm294_vm4, %v982_v17, 0.0  ;;  %v359_v27 = vsel %vm294_vm4, %v984_v18, 0.0  ;;  %v1000_v35 = vsel %vm434_vm9, 1.0, %v852_v0 }
  0x41   : > { %v251_v28 = vsub.f32 %v234_v3, %v249_v21  ;;  %v252_v29 = vsub.f32 %v235_v4, %v250_v22  ;;  %v257_v30 = vsub.f32 %v635_v5, %v249_v21  ;;  %v258_v31 = vsub.f32 %v636_v6, %v250_v22  ;;  %v308_v3 = vld [vmem:[#allocation2 + $0x4] sm:$0x1]  ;;  %v357_v6 = vld [vmem:[#allocation2 + $0x5] sm:$0x1] }
  0x42   : > { %v265_v32 = vsub.f32 %v637_v9, %v249_v21  ;;  %v266_v33 = vsub.f32 %v638_v10, %v250_v22  ;;  %v273_v34 = vsub.f32 %v639_v11, %v249_v21  ;;  %v311_v39 = vadd.f32 %v310_v25, %v309_v24  ;;  %v405_v21 = vld [vmem:[#allocation2 + $0x6] sm:$0x1] }
  0x43   : > { %v253_v36 = vmul.f32 1.442695, %v251_v28  ;;  %v255_v37 = vmul.f32 1.442695, %v252_v29  ;;  %v259_v38 = vmul.f32 1.442695, %v257_v30  ;;  %v274_v42 = vsub.f32 %v640_v12, %v250_v22 }
  0x44   : > { %v261_v40 = vmul.f32 1.442695, %v258_v31  ;;  %v267_v41 = vmul.f32 1.442695, %v265_v32  ;;  %v360_v43 = vadd.f32 %v359_v27, %v358_v26  ;;  %v269_v44 = vmul.f32 1.442695, %v266_v33 }
  0x45   : > { %716 = vpow2.f32 %v253_v36  ;;  %v275_v45 = vmul.f32 1.442695, %v273_v34  ;;  %v312_v46 = vrot.slane %v311_v39, 4  ;;  %v406_v48 = vsel %vm294_vm4, %v986_v19, 0.0  ;;  %v453_v27 = vld [vmem:[#allocation2 + $0x7] sm:$0x1] }
  0x46   : > { %718 = vpow2.f32 %v255_v37  ;;  %v361_v47 = vrot.slane %v360_v43, 4  ;;  %v407_v49 = vsel %vm294_vm4, %v988_v20, 0.0  ;;  %v454_v52 = vsel %vm294_vm4, %v990_v23, 0.0 }
  0x47   : > { %720 = vpow2.f32 %v259_v38  ;;  %v313_v50 = vadd.f32 %v312_v46, %v311_v39  ;;  %v408_v51 = vadd.f32 %v407_v49, %v406_v48  ;;  %v277_v53 = vmul.f32 1.442695, %v274_v42 }
  0x48   : > { %722 = vpow2.f32 %v261_v40  ;;  %v362_v54 = vadd.f32 %v361_v47, %v360_v43  ;;  %v455_v55 = vsel %vm294_vm4, %v1000_v35, 0.0  ;;  %vm305_vm10 = vcmask 122880  }
  0x49   : > { %724 = vpow2.f32 %v267_v41  ;;  %v314_v56 = vrot.slane %v313_v50, 2  ;;  %v409_v57 = vrot.slane %v408_v51, 4  ;;  %v456_v58 = vadd.f32 %v455_v55, %v454_v52 }
  0x4a   : > { %726 = vpow2.f32 %v269_v44  ;;  %v363_v59 = vrot.slane %v362_v54, 2  ;;  %vm512_vm11 = vcmask 1041409   ;;  %vm514_vm12 = vcmask 1042434  }
  0x4b   : > { %728 = vpow2.f32 %v275_v45  ;;  %v315_v60 = vadd.f32 %v314_v56, %v313_v50  ;;  %v410_v61 = vadd.f32 %v409_v57, %v408_v51  ;;  %v457_v62 = vrot.slane %v456_v58, 4 }
  0x4c   : > { %730 = vpow2.f32 %v277_v53  ;;  %v364_v63 = vadd.f32 %v363_v59, %v362_v54  ;;  %vm517_vm13 = vcmask 26624  }
  0x4d   : > { %v316_v0 = vrot.slane %v315_v60, 1  ;;  %v411_v1 = vrot.slane %v410_v61, 2  ;;  %v458_v2 = vadd.f32 %v457_v62, %v456_v58 }
  0x4e   : > { %v365_v4 = vrot.slane %v364_v63, 1 }
  0x4f   : > { %v317_v5 = vadd.f32 %v316_v0, %v315_v60  ;;  %v412_v7 = vadd.f32 %v411_v1, %v410_v61  ;;  %v459_v8 = vrot.slane %v458_v2, 2 }
  0x50   : > { %v366_v9 = vadd.f32 %v365_v4, %v364_v63 }
  0x51   : > { %v318_v10 = vadd.f32 %v317_v5, %v308_v3  ;;  %v413_v11 = vrot.slane %v412_v7, 1  ;;  %v460_v12 = vadd.f32 %v459_v8, %v458_v2 }
  0x52   : > { %v717_v15 = vpop.eup %716  ;;  %v367_v16 = vadd.f32 %v366_v9, %v357_v6 }
  0x53   : > { %v719_v22 = vpop.eup %718  ;;  %319 = vst.msk [vmem:[#allocation2 + $0x4] sm:$0x1] %vm305_vm10, %v318_v10  ;;  %v414_v24 = vadd.f32 %v413_v11, %v412_v7  ;;  %v461_v25 = vrot.slane %v460_v12, 1 }
  0x54   : > { %v721_v26 = vpop.eup %720  ;;  %368 = vst.msk [vmem:[#allocation2 + $0x5] sm:$0x1] %vm305_vm10, %v367_v16 }
  0x55   : > { %v723_v28 = vpop.eup %722  ;;  %v263_v29 = vadd.f32 %v721_v26, %v717_v15  ;;  %v415_v30 = vadd.f32 %v414_v24, %v405_v21  ;;  %v462_v31 = vadd.f32 %v461_v25, %v460_v12 }
  0x56   : > { %v725_v32 = vpop.eup %724  ;;  %v264_v33 = vadd.f32 %v723_v28, %v719_v22 }
  0x57   : > { %v727_v34 = vpop.eup %726  ;;  %v271_v36 = vadd.f32 %v725_v32, %v263_v29  ;;  %416 = vst.msk [vmem:[#allocation2 + $0x6] sm:$0x1] %vm305_vm10, %v415_v30  ;;  %v463_v37 = vadd.f32 %v462_v31, %v453_v27 }
  0x58   : > { %v729_v38 = vpop.eup %728  ;;  %v272_v39 = vadd.f32 %v727_v34, %v264_v33 }
  0x59   : > { %v731_v40 = vpop.eup %730  ;;  %v279_v41 = vadd.f32 %v729_v38, %v271_v36  ;;  %464 = vst.msk [vmem:[#allocation2 + $0x7] sm:$0x1] %vm305_vm10, %v463_v37 }
  0x5a   : > { %v280_v42 = vadd.f32 %v731_v40, %v272_v39 }
  0x5b   : > { %732 = vrcp.f32 %v279_v41  ;;  %v291_v41 = vld [vmem:[#allocation2] sm:$0x1] }
  0x5c   : > { %734 = vrcp.f32 %v280_v42  ;;  %v343_v42 = vld [vmem:[#allocation2 + $0x1] sm:$0x1] }
  0x68   : > { %v733_v43 = vpop.eup %732 }
  0x69   : > { %v735_v44 = vpop.eup %734  ;;  %v283_v45 = vmul.f32 %v733_v43, %v717_v15  ;;  %v335_v46 = vmul.f32 %v733_v43, %v721_v26  ;;  %v383_v47 = vmul.f32 %v733_v43, %v725_v32  ;;  %v431_v48 = vmul.f32 %v733_v43, %v729_v38 }
  0x6a   : > { %v284_v49 = vmul.f32 %v735_v44, %v719_v22  ;;  %v336_v50 = vmul.f32 %v735_v44, %v723_v28  ;;  %v384_v51 = vmul.f32 %v735_v44, %v727_v34  ;;  %v1014_v52 = vmul.f32 %v735_v44, %v731_v40 }
  0x6b   : > { %v292_v53 = vmul.f32 %v978_v13, %v283_v45  ;;  %v344_v54 = vmul.f32 %v982_v17, %v335_v46  ;;  %v392_v55 = vmul.f32 %v986_v19, %v383_v47  ;;  %v440_v56 = vmul.f32 %v990_v23, %v431_v48 }
  0x6c   : > { %v293_v57 = vmul.f32 %v980_v14, %v284_v49  ;;  %v345_v58 = vmul.f32 %v984_v18, %v336_v50  ;;  %v393_v59 = vmul.f32 %v988_v20, %v384_v51  ;;  %v441_v60 = vmul.f32 %v1000_v35, %v1014_v52 }
  0x6d   : > { %v295_v61 = vsel %vm294_vm4, %v292_v53, 0.0  ;;  %v346_v62 = vsel %vm294_vm4, %v344_v54, 0.0  ;;  %v394_v13 = vsel %vm294_vm4, %v392_v55, 0.0  ;;  %v442_v17 = vsel %vm294_vm4, %v440_v56, 0.0  ;;  %v439_v54 = vld [vmem:[#allocation2 + $0x3] sm:$0x1] }
  0x6e   : > { %v296_v19 = vsel %vm294_vm4, %v293_v57, 0.0  ;;  %v347_v23 = vsel %vm294_vm4, %v345_v58, 0.0  ;;  %v395_v14 = vsel %vm294_vm4, %v393_v59, 0.0  ;;  %v443_v18 = vsel %vm294_vm4, %v441_v60, 0.0 }
  0x6f   : > { %v297_v20 = vadd.f32 %v296_v19, %v295_v61  ;;  %v348_v63 = vadd.f32 %v347_v23, %v346_v62  ;;  %v396_v0 = vadd.f32 %v395_v14, %v394_v13  ;;  %v444_v35 = vadd.f32 %v443_v18, %v442_v17 }
  0x70   : > { %v322_v1 = vmul.f32 %v283_v45, %v283_v45  ;;  %v323_v2 = vmul.f32 %v284_v49, %v284_v49  ;;  %v370_v3 = vmul.f32 %v335_v46, %v335_v46  ;;  %v371_v4 = vmul.f32 %v336_v50, %v336_v50  ;;  %v391_v50 = vld [vmem:[#allocation2 + $0x2] sm:$0x1] }
  0x71   : > { %v298_v5 = vrot.slane %v297_v20, 4  ;;  %v349_v6 = vrot.slane %v348_v63, 4  ;;  %v397_v7 = vrot.slane %v396_v0, 4  ;;  %v445_v8 = vrot.slane %v444_v35, 4 }
  0x72   : > { %v324_v9 = vsel %vm294_vm4, %v322_v1, 0.0  ;;  %v325_v10 = vsel %vm294_vm4, %v323_v2, 0.0  ;;  %v372_v11 = vsel %vm294_vm4, %v370_v3, 0.0  ;;  %v373_v12 = vsel %vm294_vm4, %v371_v4, 0.0  ;;  %v369_v2 = vld [vmem:[#allocation2 + $0x9] sm:$0x1] }
  0x73   : > { %v299_v15 = vadd.f32 %v298_v5, %v297_v20  ;;  %v350_v16 = vadd.f32 %v349_v6, %v348_v63  ;;  %v398_v21 = vadd.f32 %v397_v7, %v396_v0  ;;  %v446_v22 = vadd.f32 %v445_v8, %v444_v35 }
  0x74   : > { %v326_v24 = vadd.f32 %v325_v10, %v324_v9  ;;  %v374_v25 = vadd.f32 %v373_v12, %v372_v11  ;;  %v418_v26 = vmul.f32 %v383_v47, %v383_v47  ;;  %v419_v27 = vmul.f32 %v384_v51, %v384_v51  ;;  %v417_v11 = vld [vmem:[#allocation2 + $0xa] sm:$0x1] }
  0x75   : > { %v300_v28 = vrot.slane %v299_v15, 2  ;;  %v351_v29 = vrot.slane %v350_v16, 2  ;;  %v399_v30 = vrot.slane %v398_v21, 2  ;;  %v447_v31 = vrot.slane %v446_v22, 2 }
  0x76   : > { %v327_v32 = vrot.slane %v326_v24, 4  ;;  %v375_v33 = vrot.slane %v374_v25, 4  ;;  %v420_v34 = vsel %vm294_vm4, %v418_v26, 0.0  ;;  %v421_v36 = vsel %vm294_vm4, %v419_v27, 0.0 }
  0x77   : > { %v301_v37 = vadd.f32 %v300_v28, %v299_v15  ;;  %v352_v38 = vadd.f32 %v351_v29, %v350_v16  ;;  %v400_v39 = vadd.f32 %v399_v30, %v398_v21  ;;  %v448_v40 = vadd.f32 %v447_v31, %v446_v22  ;;  %v483_v22 = vld [vmem:[#allocation2 + $0x4] sm:$0xf]  ;;  %v465_v29 = vld [vmem:[#allocation2 + $0xb] sm:$0x1] }
  0x78   : > { %v328_v43 = vadd.f32 %v327_v32, %v326_v24  ;;  %v376_v44 = vadd.f32 %v375_v33, %v374_v25  ;;  %v422_v45 = vadd.f32 %v421_v36, %v420_v34  ;;  %v466_v46 = vmul.f32 %v431_v48, %v431_v48 }
  0x79   : > { %v302_v47 = vrot.slane %v301_v37, 1  ;;  %v353_v49 = vrot.slane %v352_v38, 1  ;;  %v401_v51 = vrot.slane %v400_v39, 1  ;;  %v449_v53 = vrot.slane %v448_v40, 1 }
  0x7a   : > { %v329_v55 = vrot.slane %v328_v43, 2  ;;  %v377_v56 = vrot.slane %v376_v44, 2  ;;  %v423_v57 = vrot.slane %v422_v45, 4  ;;  %v467_v58 = vmul.f32 %v1014_v52, %v1014_v52  ;;  %v321_v52 = vld [vmem:[#allocation2 + $0x8] sm:$0x1] }
  0x7b   : > { %v303_v59 = vadd.f32 %v302_v47, %v301_v37  ;;  %v354_v60 = vadd.f32 %v353_v49, %v352_v38  ;;  %v402_v61 = vadd.f32 %v401_v51, %v400_v39  ;;  %v450_v62 = vadd.f32 %v449_v53, %v448_v40 }
  0x7c   : > { %v330_v13 = vadd.f32 %v329_v55, %v328_v43  ;;  %v378_v17 = vadd.f32 %v377_v56, %v376_v44  ;;  %v424_v19 = vadd.f32 %v423_v57, %v422_v45  ;;  %v468_v48 = vsel %vm294_vm4, %v466_v46, 0.0 }
  0x7d   : > { %v304_v23 = vadd.f32 %v303_v59, %v291_v41  ;;  %v355_v14 = vadd.f32 %v354_v60, %v343_v42  ;;  %v403_v18 = vadd.f32 %v402_v61, %v391_v50  ;;  %v451_v20 = vadd.f32 %v450_v62, %v439_v54 }
  0x7e   : > { %v331_v63 = vrot.slane %v330_v13, 1  ;;  %v379_v0 = vrot.slane %v378_v17, 1  ;;  %v425_v35 = vrot.slane %v424_v19, 2  ;;  %v469_v1 = vsel %vm294_vm4, %v467_v58, 0.0 }
  0x7f   : > { %306 = vst.msk [vmem:[#allocation2] sm:$0x1] %vm305_vm10, %v304_v23  ;;  %356 = vst.msk [vmem:[#allocation2 + $0x1] sm:$0x1] %vm305_vm10, %v355_v14  ;;  %v470_v3 = vadd.f32 %v469_v1, %v468_v48  ;;  %v489_v27 = vsel %vm228_vm0, %v483_v22, 0.0  ;;  %v498_v34 = vlaneseq }
  0x80   : > { %404 = vst.msk [vmem:[#allocation2 + $0x2] sm:$0x1] %vm305_vm10, %v403_v18  ;;  %452 = vst.msk [vmem:[#allocation2 + $0x3] sm:$0x1] %vm305_vm10, %v451_v20  ;;  %v332_v4 = vadd.f32 %v331_v63, %v330_v13  ;;  %v380_v5 = vadd.f32 %v379_v0, %v378_v17  ;;  %v426_v6 = vadd.f32 %v425_v35, %v424_v19 }
  0x81   : > { %v471_v7 = vrot.slane %v470_v3, 4  ;;  %v499_v37 = vand.u32 127, %v498_v34  ;;  %v501_v38 = vshrl.u32 %v498_v34, 7 }
  0x82   : > { %v333_v8 = vadd.f32 %v332_v4, %v321_v52  ;;  %v381_v9 = vadd.f32 %v380_v5, %v369_v2  ;;  %v427_v10 = vrot.slane %v426_v6, 1 }
  0x83   : > { %v472_v12 = vadd.f32 %v471_v7, %v470_v3  ;;  %v502_v40 = vsub.s32 %v499_v37, %v501_v38 }
  0x84   : > { %334 = vst.msk [vmem:[#allocation2 + $0x8] sm:$0x1] %vm305_vm10, %v333_v8  ;;  %382 = vst.msk [vmem:[#allocation2 + $0x9] sm:$0x1] %vm305_vm10, %v381_v9  ;;  %v428_v15 = vadd.f32 %v427_v10, %v426_v6 }
  0x85   : > { %v473_v16 = vrot.slane %v472_v12, 2 }
  0x86   : > { %v429_v24 = vadd.f32 %v428_v15, %v417_v11 }
  0x87   : > { %v482_v21 = vld [vmem:[#allocation2] sm:$0xf]  ;;  %v474_v26 = vadd.f32 %v473_v16, %v472_v12 }
  0x88   : > { %v486_v25 = vsel %vm228_vm0, %v482_v21, 0.0  ;;  %430 = vst.msk [vmem:[#allocation2 + $0xa] sm:$0x1] %vm305_vm10, %v429_v24 }
  0x89   : > { %487 = vadd.xlane.f32.xlu0 %v486_v25  ;;  %v475_v28 = vrot.slane %v474_v26, 1 }
  0x8b   : > { %v476_v30 = vadd.f32 %v475_v28, %v474_v26 }
  0x8d   : > { %490 = vadd.xlane.f32.xlu0 %v489_v27  ;;  %v477_v31 = vadd.f32 %v476_v30, %v465_v29 }
  0x8f   : > { %478 = vst.msk [vmem:[#allocation2 + $0xb] sm:$0x1] %vm305_vm10, %v477_v31 }
  0x96   : > { %v484_v32 = vld [vmem:[#allocation2 + $0x8] sm:$0xf] }
  0x97   : > { %v492_v33 = vsel %vm228_vm0, %v484_v32, 0.0 }
  0x98   : > { %493 = vadd.xlane.f32.xlu1 %v492_v33 }
 0x112   : > { %v488_v36 = vpop.xlane.xlu0 %487 }
 0x113   : > { %v503_v42 = vrot.slane %v488_v36, %v502_v40 }
 0x116   : > { %v491_v39 = vpop.xlane.xlu0 %490 }
 0x117   : > { %v507_v41 = vrot.slane %v491_v39, %v502_v40 }
 0x119   : > { %v513_v43 = vsel %vm512_vm11, %v507_v41, %v503_v42 }
 0x121   : > { %v494_v44 = vpop.xlane.xlu1 %493 }
 0x122   : > { %v511_v45 = vrot.slane %v494_v44, %v502_v40 }
 0x124   : > { %v515_v46 = vsel %vm514_vm12, %v511_v45, %v513_v43 }
 0x125   : > { %518 = vst.msk [vmem:[%s223_s17] sm:$0x7] %vm517_vm13, %v515_v46 }
 0x126 PF: > { %s18_s14 = sadd.s32 1, %s846_s14   ;;  %s1084_s9 = smov %s830_s10 }
 0x127   : > { %p15_p9 = scmp.ge.s32.totalorder %s18_s14, 4   ;;  %s1085_s10 = smov %s834_s11 }
 0x128   : > { %s1086_s11 = smov %s917_s21  ;;  %s1087_s12 = smov %s842_s13 }
 0x129   : > { %s1088_s13 = smov %s1090_s16  ;;  %17 = sbr.rel (!%p15_p9) target bundleno = 6 (0x6), region = 94 }
 0x12e   :  { %538 = vsyncpa [#allocation4], 1 }
 0x12f   :  { %540 = vsyncpa [#allocation4 + $0x1], 1 }
 0x130   :  { %541 = vsyncpa [#allocation6], 1 }
 0x131   :  { %543 = vsyncpa [#allocation6 + $0x1], 1 }

</bundles_post_ra>
